<compile_context>
chip_gen: v6e
topology: v6e:2x2x1
jax: 0.10.0
libtpu: 0.0.40
codegen_flags: <defaults>
</compile_context>

<pallas_src>
import functools

import jax
import jax.numpy as jnp
from jax.experimental import pallas as pl
from jax.experimental.pallas import tpu as pltpu

NOISE_STD = 0.1   # opt['noise_std']
X_DIM = 4         # opt['x_dim']
HIDDEN = 32       # FeedForwardNet hidden width (synthetic choice)
LAYER_NUM = 2     # opt['layer_num'] -> two (Linear, tanh) hidden layers
BATCH = 256       # demo batch -> a single grid step (TB = 256)
TB_MAX = 1024     # largest batch tile (lanes).  VMEM per step is roughly
                  # 2*((D+1)+D)*TB*4 B (x/out, double-buffered) + ~4*H*TB*4 B of
                  # live activations  ~= 0.6 MiB at TB=1024 -> far below the
                  # 32 MiB limit requested below (v7x physical VMEM: 64 MiB).


def ebm_kernel(x_ref, w_ref, out_ref, *, d):
    """Fused MLP forward + analytic d(sum(net(x)))/dx, feature-major layout.

    x_ref  : (D+1, TB)  rows 0..D-1 = x.T, row D = ones (bias-fold trick for b1)
    w_ref  : (H, 3H+D+3) packed weight slab (columns):
               [0    : H)       w2
               [H    : 2H)      w2.T
               [2H   : 3H)      w1.T padded with zero rows to (H, H)
               [3H   : 3H+D+1)  [w1 | b1]
               [3H+D+1]         b2
               [3H+D+2]         -noise_std**2 * w3.sum(axis=0)
    out_ref: (D, TB)
    """
    h = w_ref.shape[0]
    x_aug = x_ref[...]                                      # (D+1, TB)

    w2 = w_ref[:, 0:h]                                      # (H, H)
    w2t = w_ref[:, h:2 * h]                                 # (H, H)
    w1tp = w_ref[:, 2 * h:3 * h]                            # (H, H), rows >= D are 0
    w1a = w_ref[:, 3 * h:3 * h + d + 1]                     # (H, D+1), last col = b1
    b2 = w_ref[:, 3 * h + d + 1:3 * h + d + 2]              # (H, 1)
    g3s = w_ref[:, 3 * h + d + 2:3 * h + d + 3]             # (H, 1)

    # ---- forward: b1 folded into the first contraction via the ones row ----
    h1 = jnp.tanh(jnp.dot(w1a, x_aug, preferred_element_type=jnp.float32))
    h2 = jnp.tanh(jnp.dot(w2, h1, preferred_element_type=jnp.float32) + b2)

    # ---- backprop of energy = sum(net(x)) w.r.t. x (upstream grad = ones);
    #      -noise_std**2 is pre-folded into g3s so no epilogue scale is needed ----
    g_z2 = g3s * (1.0 - h2 * h2)                                            # tanh'
    g_z1 = jnp.dot(w2t, g_z2, preferred_element_type=jnp.float32) * (1.0 - h1 * h1)
    delta = jnp.dot(w1tp, g_z1, preferred_element_type=jnp.float32)         # (H, TB)

    # denoised = x + noise_std**2 * x_score = x - noise_std**2 * dE/dx
    out_ref[...] = (x_aug[:d, :] + delta[:d, :]).astype(out_ref.dtype)


@functools.partial(jax.jit, static_argnames=("noise_std", "tb_max"))
def denoising_ebm_forward(noisy_x, params, noise_std=NOISE_STD, tb_max=TB_MAX):
    """DenoisingEBM.forward.  noisy_x: (B, x_dim) float32 -> (B, x_dim)."""
    w1, b1, w2, b2, w3, b3 = params
    del b3  # bias of the last Linear cancels in d(energy)/dx
    batch, d = noisy_x.shape
    h = w1.shape[0]
    noise_var = float(noise_std) ** 2

    # --- one-time, weight-only preprocessing (outside the kernel, fused by XLA) ---
    w1a = jnp.concatenate([w1, b1.reshape(h, 1)], axis=1)              # (H, D+1)
    w1tp = jnp.zeros((h, h), w1.dtype).at[:d, :].set(w1.T)             # (H, H)
    g3s = (-noise_var) * jnp.sum(w3, axis=0).reshape(h, 1)             # (H, 1)
    slab = jnp.concatenate(
        [w2, w2.T, w1tp, w1a, b2.reshape(h, 1), g3s], axis=1)          # (H, 3H+D+3)

    # --- feature-major layout + ones row + pad batch (lanes) to the tile ---
    # NOTE: these layout ops (transpose/pad here, slice+transpose on return) are
    # separate XLA ops; emitting/consuming feature-major (D, B) data at the API
    # boundary would remove them entirely.  Kept to match the (B, D) PyTorch API.
    bp = pl.cdiv(batch, 128) * 128
    tb = min(bp, tb_max)                    # fewest grid steps that fit tb_max
    bp = pl.cdiv(bp, tb) * tb
    x_aug = jnp.concatenate(
        [noisy_x.T, jnp.ones((1, batch), noisy_x.dtype)], axis=0)      # (D+1, B)
    x_aug = jnp.pad(x_aug, ((0, 0), (0, bp - batch)))                  # (D+1, bp)

    out_t = pl.pallas_call(
        functools.partial(ebm_kernel, d=d),
        out_shape=jax.ShapeDtypeStruct((d, bp), noisy_x.dtype),
        grid=(bp // tb,),
        in_specs=[pl.BlockSpec((d + 1, tb), lambda i: (0, i)),
                  # constant block index -> slab stays VMEM-resident across steps
                  pl.BlockSpec(slab.shape, lambda i: (0, 0))],
        out_specs=pl.BlockSpec((d, tb), lambda i: (0, i)),
        compiler_params=pltpu.CompilerParams(
            dimension_semantics=("parallel",),
            vmem_limit_bytes=32 * 1024 * 1024),
    )(x_aug, slab)

    return out_t[:, :batch].T


# ---------------- pure-JAX reference (for correctness check) ----------------
def _net_apply(params, x):
    w1, b1, w2, b2, w3, b3 = params
    h1 = jnp.tanh(x @ w1.T + b1)
    h2 = jnp.tanh(h1 @ w2.T + b2)
    return h2 @ w3.T + b3


def _ref_forward(noisy_x, params, noise_std=NOISE_STD):
    energy_fn = lambda x: _net_apply(params, x).sum()
    x_score = -jax.grad(energy_fn)(noisy_x)
    return noisy_x + noise_std ** 2 * x_score


def _init_params(key):
    """Deterministic synthetic weights (PyTorch Linear convention: W (out, in))."""
    ks = jax.random.split(key, 6)
    scale = 0.3
    w1 = scale * jax.random.normal(ks[0], (HIDDEN, X_DIM), jnp.float32)
    b1 = scale * jax.random.normal(ks[1], (1, HIDDEN), jnp.float32)
    w2 = scale * jax.random.normal(ks[2], (HIDDEN, HIDDEN), jnp.float32)
    b2 = scale * jax.random.normal(ks[3], (1, HIDDEN), jnp.float32)
    w3 = scale * jax.random.normal(ks[4], (X_DIM, HIDDEN), jnp.float32)
    b3 = scale * jax.random.normal(ks[5], (1, X_DIM), jnp.float32)
    return (w1, b1, w2, b2, w3, b3)


if __name__ == "__main__":
    key = jax.random.PRNGKey(0)
    k_params, k_x1, k_x2 = jax.random.split(key, 3)
    params = _init_params(k_params)

    # B=256 -> single grid step (TB=256) with the packed weight slab.
    noisy_x = jax.random.normal(k_x1, (BATCH, X_DIM), jnp.float32)
    denoised = jax.block_until_ready(denoising_ebm_forward(noisy_x, params))
    expected = _ref_forward(noisy_x, params)
    assert denoised.shape == noisy_x.shape and denoised.dtype == noisy_x.dtype
    assert jnp.allclose(denoised, expected, atol=1e-5, rtol=1e-5), (
        "Pallas kernel disagrees with JAX autodiff reference (batched)")

    # Tiny batch exercises the pad-to-128-lanes path (padded columns discarded).
    small_x = jax.random.normal(k_x2, (8, X_DIM), jnp.float32)
    small_out = jax.block_until_ready(denoising_ebm_forward(small_x, params))
    assert jnp.allclose(small_out, _ref_forward(small_x, params),
                        atol=1e-5, rtol=1e-5), (
        "Pallas kernel disagrees with JAX autodiff reference (small batch)")

    print("KERNEL_OK")
</pallas_src>

<mosaic_0001>
module attributes {stable_mosaic.version = 11 : i64} {
  func.func @ebm_kernel(%arg0: i32, %arg1: memref<5x256xf32, #tpu.memory_space<vmem>>, %arg2: memref<32x103xf32, #tpu.memory_space<vmem>>, %arg3: memref<4x256xf32, #tpu.memory_space<vmem>>) attributes {dimension_semantics = [#tpu.dimension_semantics<parallel>], iteration_bounds = array<i64: 1>, scalar_prefetch = 0 : i64, scratch_operands = 0 : i64, tpu.core_type = #tpu.core_type<tc>, window_params = [{transform_indices = @transform_0, window_bounds = array<i64: 5, 256>}, {pipeline_mode = #tpu.pipeline_mode<synchronous>, transform_indices = @transform_1, window_bounds = array<i64: 32, 103>}, {transform_indices = @transform_2, window_bounds = array<i64: 4, 256>}]} {
    %c0 = arith.constant 0 : index
    %c0_0 = arith.constant 0 : index
    %0 = vector.load %arg1[%c0, %c0_0] : memref<5x256xf32, #tpu.memory_space<vmem>>, vector<5x256xf32>
    %c0_1 = arith.constant 0 : index
    %c0_2 = arith.constant 0 : index
    %1 = vector.load %arg2[%c0_1, %c0_2] : memref<32x103xf32, #tpu.memory_space<vmem>>, vector<32x32xf32>
    %c0_3 = arith.constant 0 : index
    %c32 = arith.constant 32 : index
    %2 = vector.load %arg2[%c0_3, %c32] : memref<32x103xf32, #tpu.memory_space<vmem>>, vector<32x32xf32>
    %c0_4 = arith.constant 0 : index
    %c64 = arith.constant 64 : index
    %3 = vector.load %arg2[%c0_4, %c64] : memref<32x103xf32, #tpu.memory_space<vmem>>, vector<32x32xf32>
    %c0_5 = arith.constant 0 : index
    %c96 = arith.constant 96 : index
    %4 = vector.load %arg2[%c0_5, %c96] : memref<32x103xf32, #tpu.memory_space<vmem>>, vector<32x5xf32>
    %c0_6 = arith.constant 0 : index
    %c101 = arith.constant 101 : index
    %5 = vector.load %arg2[%c0_6, %c101] : memref<32x103xf32, #tpu.memory_space<vmem>>, vector<32x1xf32>
    %c0_7 = arith.constant 0 : index
    %c102 = arith.constant 102 : index
    %6 = vector.load %arg2[%c0_7, %c102] : memref<32x103xf32, #tpu.memory_space<vmem>>, vector<32x1xf32>
    %cst = arith.constant dense<0.000000e+00> : vector<32x256xf32>
    %7 = tpu.matmul %4, %0, %cst {dimension_numbers = #tpu.dot_dimension_numbers<[1], [0], [0], [1], [0, 0, 1, 1], [], []>} : vector<32x5xf32>, vector<5x256xf32>, vector<32x256xf32> -> vector<32x256xf32>
    %8 = math.tanh %7 : vector<32x256xf32>
    %cst_8 = arith.constant dense<0.000000e+00> : vector<32x256xf32>
    %9 = tpu.matmul %1, %8, %cst_8 {dimension_numbers = #tpu.dot_dimension_numbers<[1], [0], [0], [1], [0, 0, 1, 1], [], []>} : vector<32x32xf32>, vector<32x256xf32>, vector<32x256xf32> -> vector<32x256xf32>
    %10 = vector.broadcast %5 : vector<32x1xf32> to vector<32x256xf32>
    %11 = arith.addf %9, %10 : vector<32x256xf32>
    %12 = math.tanh %11 : vector<32x256xf32>
    %13 = arith.mulf %12, %12 : vector<32x256xf32>
    %cst_9 = arith.constant 1.000000e+00 : f32
    %14 = vector.broadcast %cst_9 : f32 to vector<32x256xf32>
    %15 = arith.subf %14, %13 : vector<32x256xf32>
    %16 = vector.broadcast %6 : vector<32x1xf32> to vector<32x256xf32>
    %17 = arith.mulf %16, %15 : vector<32x256xf32>
    %cst_10 = arith.constant dense<0.000000e+00> : vector<32x256xf32>
    %18 = tpu.matmul %2, %17, %cst_10 {dimension_numbers = #tpu.dot_dimension_numbers<[1], [0], [0], [1], [0, 0, 1, 1], [], []>} : vector<32x32xf32>, vector<32x256xf32>, vector<32x256xf32> -> vector<32x256xf32>
    %19 = arith.mulf %8, %8 : vector<32x256xf32>
    %cst_11 = arith.constant 1.000000e+00 : f32
    %20 = vector.broadcast %cst_11 : f32 to vector<32x256xf32>
    %21 = arith.subf %20, %19 : vector<32x256xf32>
    %22 = arith.mulf %18, %21 : vector<32x256xf32>
    %cst_12 = arith.constant dense<0.000000e+00> : vector<32x256xf32>
    %23 = tpu.matmul %3, %22, %cst_12 {dimension_numbers = #tpu.dot_dimension_numbers<[1], [0], [0], [1], [0, 0, 1, 1], [], []>} : vector<32x32xf32>, vector<32x256xf32>, vector<32x256xf32> -> vector<32x256xf32>
    %24 = vector.extract_strided_slice %0 {offsets = [0, 0], sizes = [4, 256], strides = [1, 1]} : vector<5x256xf32> to vector<4x256xf32>
    %25 = vector.extract_strided_slice %23 {offsets = [0, 0], sizes = [4, 256], strides = [1, 1]} : vector<32x256xf32> to vector<4x256xf32>
    %26 = arith.addf %24, %25 : vector<4x256xf32>
    %c0_13 = arith.constant 0 : index
    %c0_14 = arith.constant 0 : index
    %27 = vector.load %arg3[%c0_13, %c0_14] : memref<4x256xf32, #tpu.memory_space<vmem>>, vector<4x256xf32>
    tpu.vector_store %arg3[%c0_13, %c0_14], %26 {strides = array<i32>} : memref<4x256xf32, #tpu.memory_space<vmem>>, vector<4x256xf32>,
    return
  }
  func.func @transform_0(%arg0: i32) -> (i32, i32) {
    %c0_i32 = arith.constant 0 : i32
    %c0_i32_0 = arith.constant 0 : i32
    return %c0_i32, %arg0 : i32, i32
  }
  func.func @transform_1(%arg0: i32) -> (i32, i32) {
    %c0_i32 = arith.constant 0 : i32
    %c0_i32_0 = arith.constant 0 : i32
    %c0_i32_1 = arith.constant 0 : i32
    return %c0_i32, %c0_i32_0 : i32, i32
  }
  func.func @transform_2(%arg0: i32) -> (i32, i32) {
    %c0_i32 = arith.constant 0 : i32
    %c0_i32_0 = arith.constant 0 : i32
    return %c0_i32, %arg0 : i32, i32
  }
}

</mosaic_0001>

<bundles_post_ra>
// kernel: denoising_ebm_forward.1
= control target key start
LH: loop header
LB: loop body
LE: loop exit
PB: predicated region body
PF: predicated region fallthrough
CT: control target
= control target key end

     0   :  { %vm39_vm0 = vcmask 1044480   ;;  %s637_s13 = smov 32   ;;  %v638_v5 = vmov 0.0   ;;  %s788_s0 = inlined_call_operand.vmem [shape: f32[5,256], index: 0, kind: input, shape index: {}]   ;;  %s789_s1 = inlined_call_operand.vmem [shape: f32[32,103], index: 1, kind: input, shape index: {}]   ;;  %s790_s2 = inlined_call_operand.hbm [shape: f32[4,256], index: 2, kind: output, shape index: {}]  }
   0x1   :  { %v662_v0 = vld [vmem:[%s789_s1] sm:$0xff]  ;;  %v667_v1 = vld [vmem:[%s789_s1 + $0x10] sm:$0xff]  ;;  %v673_v2 = vld [vmem:[%s789_s1 + $0x8] sm:$0xff]  ;;  %110 = vmatprep.mubr.f32.mxu0 %v638_v5 }
   0x2   :  { %22 = vrot.lane.b32.xlu0 %v662_v0, %s637_s13  ;;  %26 = vrot.lane.b32.xlu1 %v667_v1, %s637_s13  ;;  %v679_v3 = vld [vmem:[%s788_s0 + $0x8] sm:$0x1f]  ;;  %v684_v4 = vld [vmem:[%s789_s1 + $0x18] sm:$0xff] }
   0x3   :  { %554 = vmatprep.subr.msk.mxu0 %vm39_vm0, %v679_v3  ;;  %v691_v6 = vld [vmem:[%s788_s0] sm:$0x1f] }
   0x4   :  { %7 = vsyncpa [#allocation3], 0  ;;  %555 = vmatpush1.msk.msra.mxu0 %vm39_vm0, %v691_v6  ;;  %232 = vmatprep.mubr.f32.mxu1 %v638_v5  ;;  %vm30_vm1 = vcmask 39936   ;;  %v639_v11 = vmov 101   ;;  %v640_v12 = vmov 102   ;;  %s641_s0 = smov 96  }
   0x5   :  { %579 = vset.pattern.permute.xlu0 %v639_v11  ;;  %580 = vset.pattern.permute.xlu1 %v639_v11  ;;  %vm159_vm2 = vcmask 261120   ;;  %s642_s1 = smov 64   ;;  %s643_s22 = smov [#allocation2]  }
   0x6   :  { %24 = vrot.lane.b32.xlu0 %v673_v2, %s637_s13  ;;  %28 = vrot.lane.b32.xlu1 %v684_v4, %s637_s13  ;;  %s546_s23 = sshll.u32 %s643_s22, 4  ;;  %s547_s23 = int_to_ptr.vmem [resolvable:$true] %s546_s23 }
   0x7   :  { %s615_s24 = scalar_lea.vmem %s547_s23, 128  ;;  %p620_p1 = scmp.lt.s32.totalorder %s547_s23, %s547_s23 }
   0x8   :  { %p616_p0 = scmp.ne.s32.totalorder %s547_s23, %s615_s24  ;;  %p621_p2 = scmp.lt.s32.totalorder %s615_s24, %s615_s24 }
   0xa   :  { %156 = vperm.xlu0 %579, %v684_v4   ;;  %152 = vperm.xlu1 %580, %v667_v1   ;;  %p622_p3 = por %p621_p2, %p620_p1 }
   0xc   :  { %p623_p4 = pnand %p622_p3, %p616_p0 }
   0xe   :  { %144 = vperm.xlu0 %579, %v662_v0   ;;  %148 = vperm.xlu1 %580, %v673_v2  }
  0x12   :  { %581 = vset.pattern.permute.xlu1 %v640_v12  ;;  %582 = vset.pattern.permute.xlu0 %v640_v12 }
  0x13   :  { %294 = vperm.xlu1 %581, %v684_v4   ;;  %290 = vperm.xlu0 %582, %v667_v1  }
  0x17   :  { %286 = vperm.xlu1 %581, %v673_v2   ;;  %305 = vrot.lane.b32.xlu0 %v662_v0, %s641_s0 }
  0x1b   :  { %282 = vperm.xlu1 %581, %v662_v0   ;;  %309 = vrot.lane.b32.xlu0 %v667_v1, %s641_s0 }
  0x1f   :  { %307 = vrot.lane.b32.xlu1 %v673_v2, %s641_s0  ;;  %434 = vrot.lane.b32.xlu0 %v662_v0, %s642_s1 }
  0x23   :  { %311 = vrot.lane.b32.xlu1 %v684_v4, %s641_s0  ;;  %438 = vrot.lane.b32.xlu0 %v667_v1, %s642_s1 }
  0x27   :  { %436 = vrot.lane.b32.xlu1 %v673_v2, %s642_s1 }
  0x2b   :  { %440 = vrot.lane.b32.xlu1 %v684_v4, %s642_s1 }
  0x74   :  { %v23_v7 = vpop.permute.xlu0 %22  ;;  %v27_v9 = vpop.permute.xlu1 %26 }
  0x75   :  { %556 = vmatmul.mubr.msk.f32.vlgmr.msra.gmra.mxu0 %vm30_vm1, %v23_v7 }
  0x76   :  { %116 = vmatprep.mubr.f32.mxu0 %v638_v5 }
  0x78   :  { %v25_v8 = vpop.permute.xlu0 %24  ;;  %v29_v10 = vpop.permute.xlu1 %28 }
  0x79   :  { %557 = vmatmul.mubr.msk.f32.gmra.mxu0 %vm30_vm1, %v25_v8 }
  0x7a   :  { %122 = vmatprep.mubr.f32.mxu0 %v638_v5 }
  0x7d   :  { %558 = vmatmul.mubr.msk.f32.gmra.mxu0 %vm30_vm1, %v27_v9 }
  0x7e   :  { %128 = vmatprep.mubr.f32.mxu0 %v638_v5 }
  0x81   :  { %559 = vmatmul.mubr.msk.f32.gmra.mxu0 %vm30_vm1, %v29_v10 }
  0x82   :  { %385 = vmatprep.mubr.f32.mxu0 %v638_v5 }
  0x85   :  { %v157_v29 = vpop.permute.xlu0 %156  ;;  %v153_v31 = vpop.permute.xlu1 %152 }
  0x89   :  { %v145_v34 = vpop.permute.xlu0 %144  ;;  %v149_v37 = vpop.permute.xlu1 %148 }
  0x8e   :  { %v295_v53 = vpop.permute.xlu1 %294  ;;  %v291_v11 = vpop.permute.xlu0 %290 }
 0x135   :  { %v112_v13 = vpop.f32.mrf.mxu0 }
 0x137   :  { %v114_v14 = vpop.f32.mrf.mxu0 }
 0x139   :  { %v118_v15 = vpop.f32.mrf.mxu0 }
 0x13b   :  { %v120_v16 = vpop.f32.mrf.mxu0 }
 0x13d   :  { %v124_v17 = vpop.f32.mrf.mxu0 }
 0x13f   :  { %v126_v18 = vpop.f32.mrf.mxu0 }
 0x141   :  { %v130_v19 = vpop.f32.mrf.mxu0 }
 0x143   :  { %v132_v20 = vpop.f32.mrf.mxu0 }
 0x144   :  { %583 = vtanh.f32 %v132_v20 }
 0x145   :  { %585 = vtanh.f32 %v130_v19 }
 0x146   :  { %587 = vtanh.f32 %v126_v18 }
 0x147   :  { %589 = vtanh.f32 %v124_v17 }
 0x148   :  { %591 = vtanh.f32 %v120_v16 }
 0x149   :  { %593 = vtanh.f32 %v118_v15 }
 0x14a   :  { %595 = vtanh.f32 %v114_v14 }
 0x14b   :  { %597 = vtanh.f32 %v112_v13 }
 0x151   :  { %v713_v21 = vpop.eup %583 }
 0x152   :  { %v715_v22 = vpop.eup %585  ;;  %192 = vmatprep.subr.mxu1 %v713_v21 }
 0x153   :  { %v718_v23 = vpop.eup %587  ;;  %193 = vmatpush1.msra.mxu1 %v715_v22 }
 0x154   :  { %v721_v24 = vpop.eup %589  ;;  %194 = vmatprep.subr.mxu1 %v718_v23 }
 0x155   :  { %v724_v25 = vpop.eup %591  ;;  %195 = vmatpush1.msra.mxu1 %v721_v24 }
 0x156   :  { %v727_v26 = vpop.eup %593  ;;  %196 = vmatprep.subr.mxu1 %v724_v25 }
 0x157   :  { %v730_v27 = vpop.eup %595  ;;  %197 = vmatpush1.msra.mxu1 %v727_v26 }
 0x158   :  { %v733_v28 = vpop.eup %597  ;;  %198 = vmatprep.subr.mxu1 %v730_v27 }
 0x159   :  { %199 = vmatpush1.msra.mxu1 %v733_v28 }
 0x15a   :  { %560 = vmatmul.mubr.msk.f32.vlgmr.msra.gmra.mxu1 %vm159_vm2, %v662_v0 }
 0x15b   :  { %238 = vmatprep.mubr.f32.mxu1 %v638_v5 }
 0x15e   :  { %561 = vmatmul.mubr.msk.f32.gmra.mxu1 %vm159_vm2, %v673_v2  ;;  %v287_v2 = vpop.permute.xlu1 %286 }
 0x15f   :  { %244 = vmatprep.mubr.f32.mxu1 %v638_v5 }
 0x162   :  { %562 = vmatmul.mubr.msk.f32.gmra.mxu1 %vm159_vm2, %v667_v1  ;;  %v283_v20 = vpop.permute.xlu1 %282 }
 0x163   :  { %250 = vmatprep.mubr.f32.mxu1 %v638_v5 }
 0x166   :  { %563 = vmatmul.mubr.msk.f32.gmra.mxu1 %vm159_vm2, %v684_v4 }
 0x167   :  { %514 = vmatprep.mubr.f32.mxu1 %v638_v5 }
 0x21a   :  { %v234_v30 = vpop.f32.mrf.mxu1 }
 0x21b   :  { %v235_v46 = vadd.f32 %v234_v30, %v145_v34 }
 0x21c   :  { %v236_v32 = vpop.f32.mrf.mxu1 }
 0x21d   :  { %v237_v36 = vadd.f32 %v236_v32, %v145_v34  ;;  %v306_v32 = vpop.permute.xlu0 %305 }
 0x21e   :  { %v240_v33 = vpop.f32.mrf.mxu1 }
 0x21f   :  { %599 = vtanh.f32 %v237_v36  ;;  %v241_v43 = vadd.f32 %v240_v33, %v149_v37  ;;  %v308_v33 = vpop.permute.xlu1 %307 }
 0x220   :  { %v242_v35 = vpop.f32.mrf.mxu1 }
 0x221   :  { %v243_v38 = vadd.f32 %v242_v35, %v149_v37  ;;  %v310_v34 = vpop.permute.xlu0 %309 }
 0x222   :  { %v246_v39 = vpop.f32.mrf.mxu1 }
 0x223   :  { %v247_v40 = vadd.f32 %v246_v39, %v153_v31  ;;  %601 = vtanh.f32 %v243_v38  ;;  %v312_v35 = vpop.permute.xlu1 %311 }
 0x224   :  { %v248_v41 = vpop.f32.mrf.mxu1 }
 0x225   :  { %v249_v42 = vadd.f32 %v248_v41, %v153_v31  ;;  %v417_v41 = vmul.f32 %v713_v21, %v713_v21 }
 0x226   :  { %v252_v44 = vpop.f32.mrf.mxu1 }
 0x227   :  { %603 = vtanh.f32 %v249_v42  ;;  %v253_v45 = vadd.f32 %v252_v44, %v157_v29  ;;  %v415_v44 = vmul.f32 %v718_v23, %v718_v23  ;;  %v410_v23 = vmul.f32 %v733_v28, %v733_v28  ;;  %v437_v28 = vpop.permute.xlu1 %436 }
 0x228   :  { %605 = vtanh.f32 %v247_v40  ;;  %v254_v47 = vpop.f32.mrf.mxu1 }
 0x229   :  { %607 = vtanh.f32 %v253_v45  ;;  %v255_v48 = vadd.f32 %v254_v47, %v157_v29  ;;  %v414_v45 = vmul.f32 %v721_v24, %v721_v24  ;;  %v413_v47 = vmul.f32 %v724_v25, %v724_v25 }
 0x22a   :  { %609 = vtanh.f32 %v241_v43  ;;  %v416_v43 = vmul.f32 %v715_v22, %v715_v22  ;;  %v423_v22 = vsub.f32 1.0, %v415_v44 }
 0x22b   :  { %611 = vtanh.f32 %v255_v48  ;;  %v425_v48 = vsub.f32 1.0, %v417_v41 }
 0x22c   :  { %613 = vtanh.f32 %v235_v46  ;;  %v600_v49 = vpop.eup %599 }
 0x22d   :  { %v266_v4 = vmul.f32 %v600_v49, %v600_v49  ;;  %v412_v49 = vmul.f32 %v727_v26, %v727_v26 }
 0x22f   :  { %v274_v15 = vsub.f32 1.0, %v266_v4  ;;  %v420_v25 = vsub.f32 1.0, %v412_v49 }
 0x230   :  { %v602_v50 = vpop.eup %601 }
 0x231   :  { %v268_v62 = vmul.f32 %v602_v50, %v602_v50  ;;  %v298_v30 = vmul.f32 %v283_v20, %v274_v15  ;;  %v424_v50 = vsub.f32 1.0, %v416_v43 }
 0x233   :  { %v276_v10 = vsub.f32 1.0, %v268_v62 }
 0x234   :  { %v604_v51 = vpop.eup %603 }
 0x235   :  { %v606_v52 = vpop.eup %605  ;;  %v270_v57 = vmul.f32 %v604_v51, %v604_v51  ;;  %v300_v19 = vmul.f32 %v287_v2, %v276_v10  ;;  %v411_v51 = vmul.f32 %v730_v27, %v730_v27 }
 0x236   :  { %v608_v54 = vpop.eup %607  ;;  %v269_v59 = vmul.f32 %v606_v52, %v606_v52 }
 0x237   :  { %v610_v55 = vpop.eup %609  ;;  %v271_v56 = vmul.f32 %v608_v54, %v608_v54  ;;  %v278_v7 = vsub.f32 1.0, %v270_v57  ;;  %v421_v54 = vsub.f32 1.0, %v413_v47  ;;  %v419_v57 = vsub.f32 1.0, %v411_v51 }
 0x238   :  { %v612_v58 = vpop.eup %611  ;;  %v267_v0 = vmul.f32 %v610_v55, %v610_v55  ;;  %v277_v9 = vsub.f32 1.0, %v269_v59 }
 0x239   :  { %v614_v60 = vpop.eup %613  ;;  %v272_v61 = vmul.f32 %v612_v58, %v612_v58  ;;  %v279_v63 = vsub.f32 1.0, %v271_v56  ;;  %v302_v16 = vmul.f32 %v291_v11, %v278_v7  ;;  %v418_v58 = vsub.f32 1.0, %v410_v23 }
 0x23a   :  { %v265_v8 = vmul.f32 %v614_v60, %v614_v60  ;;  %v275_v14 = vsub.f32 1.0, %v267_v0  ;;  %v301_v18 = vmul.f32 %v291_v11, %v277_v9 }
 0x23b   :  { %v280_v1 = vsub.f32 1.0, %v272_v61  ;;  %v303_v13 = vmul.f32 %v295_v53, %v279_v63  ;;  %v435_v61 = vpop.permute.xlu0 %434  ;;  %v441_v63 = vpop.permute.xlu1 %440 }
 0x23c   :  { %v273_v17 = vsub.f32 1.0, %v265_v8  ;;  %v299_v29 = vmul.f32 %v287_v2, %v275_v14 }
 0x23d   :  { %v304_v12 = vmul.f32 %v295_v53, %v280_v1  ;;  %v422_v53 = vsub.f32 1.0, %v414_v45 }
 0x23e   :  { %v297_v31 = vmul.f32 %v283_v20, %v273_v17 }
 0x23f   :  { %345 = vmatprep.subr.mxu0 %v304_v12  ;;  %v439_v62 = vpop.permute.xlu0 %438 }
 0x240   :  { %346 = vmatpush1.msra.mxu0 %v303_v13 }
 0x241   :  { %347 = vmatprep.subr.mxu0 %v302_v16 }
 0x242   :  { %348 = vmatpush1.msra.mxu0 %v301_v18 }
 0x243   :  { %349 = vmatprep.subr.mxu0 %v300_v19 }
 0x244   :  { %350 = vmatpush1.msra.mxu0 %v299_v29 }
 0x245   :  { %351 = vmatprep.subr.mxu0 %v298_v30 }
 0x246   :  { %352 = vmatpush1.msra.mxu0 %v297_v31 }
 0x247   :  { %564 = vmatmul.mubr.msk.f32.vlgmr.msra.gmra.mxu0 %vm159_vm2, %v306_v32 }
 0x248   :  { %391 = vmatprep.mubr.f32.mxu0 %v638_v5 }
 0x24b   :  { %565 = vmatmul.mubr.msk.f32.gmra.mxu0 %vm159_vm2, %v308_v33 }
 0x24c   :  { %397 = vmatprep.mubr.f32.mxu0 %v638_v5 }
 0x24f   :  { %566 = vmatmul.mubr.msk.f32.gmra.mxu0 %vm159_vm2, %v310_v34 }
 0x250   :  { %403 = vmatprep.mubr.f32.mxu0 %v638_v5 }
 0x253   :  { %567 = vmatmul.mubr.msk.f32.gmra.mxu0 %vm159_vm2, %v312_v35 }
 0x307   :  { %v387_v36 = vpop.f32.mrf.mxu0 }
 0x308   :  { %v426_v60 = vmul.f32 %v418_v58, %v387_v36 }
 0x309   :  { %v389_v37 = vpop.f32.mrf.mxu0 }
 0x30a   :  { %v427_v27 = vmul.f32 %v419_v57, %v389_v37 }
 0x30b   :  { %v393_v38 = vpop.f32.mrf.mxu0 }
 0x30c   :  { %v428_v59 = vmul.f32 %v420_v25, %v393_v38 }
 0x30d   :  { %v395_v39 = vpop.f32.mrf.mxu0 }
 0x30e   :  { %v429_v26 = vmul.f32 %v421_v54, %v395_v39 }
 0x30f   :  { %v399_v40 = vpop.f32.mrf.mxu0 }
 0x310   :  { %v430_v56 = vmul.f32 %v422_v53, %v399_v40 }
 0x311   :  { %v401_v42 = vpop.f32.mrf.mxu0 }
 0x312   :  { %v431_v55 = vmul.f32 %v423_v22, %v401_v42 }
 0x313   :  { %v405_v46 = vpop.f32.mrf.mxu0 }
 0x314   :  { %v432_v24 = vmul.f32 %v424_v50, %v405_v46 }
 0x315   :  { %v407_v21 = vpop.f32.mrf.mxu0 }
 0x316   :  { %v433_v52 = vmul.f32 %v425_v48, %v407_v21 }
 0x318   :  { %474 = vmatprep.subr.mxu1 %v433_v52 }
 0x319   :  { %475 = vmatpush1.msra.mxu1 %v432_v24 }
 0x31a   :  { %476 = vmatprep.subr.mxu1 %v431_v55 }
 0x31b   :  { %477 = vmatpush1.msra.mxu1 %v430_v56 }
 0x31c   :  { %478 = vmatprep.subr.mxu1 %v429_v26 }
 0x31d   :  { %479 = vmatpush1.msra.mxu1 %v428_v59 }
 0x31e   :  { %480 = vmatprep.subr.mxu1 %v427_v27 }
 0x31f   :  { %481 = vmatpush1.msra.mxu1 %v426_v60 }
 0x320   :  { %568 = vmatmul.mubr.msk.f32.vlgmr.msra.gmra.mxu1 %vm159_vm2, %v435_v61 }
 0x321   :  { %520 = vmatprep.mubr.f32.mxu1 %v638_v5 }
 0x324   :  { %569 = vmatmul.mubr.msk.f32.gmra.mxu1 %vm159_vm2, %v437_v28 }
 0x325   :  { %524 = vmatprep.mubr.f32.mxu1 %v638_v5 }
 0x328   :  { %570 = vmatmul.mubr.msk.f32.gmra.mxu1 %vm159_vm2, %v439_v62 }
 0x329   :  { %528 = vmatprep.mubr.f32.mxu1 %v638_v5 }
 0x32c   :  { %571 = vmatmul.mubr.msk.f32.gmra.mxu1 %vm159_vm2, %v441_v63 }
 0x3e0   :  { %v516_v0 = vpop.f32.mrf.mxu1 }
 0x3e1   :  { %v533_v2 = vadd.f32 %v516_v0, %v691_v6 }
 0x3e2   :  { %v518_v1 = vpop.f32.mrf.mxu1 }
 0x3e3   :  { %v534_v4 = vadd.f32 %v518_v1, %v679_v3 }
 0x3e4   :  { %v522_v7 = vpop.f32.mrf.mxu1 }
 0x3e5   :  { %v537_v8 = vcombine.low %v533_v2, %v534_v4 }
 0x3e6   :  { %v523_v9 = vpop.f32.mrf.mxu1 }
 0x3e7   :  { %539 = vst [vmem:[#allocation2] sm:$0xff] %v537_v8 }
 0x3e8   :  { %v526_v10 = vpop.f32.mrf.mxu1 }
 0x3e9   :  { %626 = shalt.err (!%p623_p4)
}
 0x3ea   :  { %549 = dma.vmem_to_hbm [thread:$0]  %s547_s23, 128, %s790_s2, [#allocation3]   ;;  %v527_v5 = vpop.f32.mrf.mxu1 }
 0x3ec   :  { %v530_v6 = vpop.f32.mrf.mxu1 }
 0x3ee   :  { %v531_v3 = vpop.f32.mrf.mxu1 }
 0x3ef   :  { %635 = dma.done.wait [#allocation3], 128  }
 0x3f0   :  { %636 = vsyncadd [#allocation3], 4294967168 }
 0x3f1   :  { %553 = vsyncpa [#allocation3], 1 }

</bundles_post_ra>
